<compile_context>
chip_gen: v7x
topology: tpu7x:2x2x1
jax: 0.10.0
libtpu: 0.0.40
codegen_flags: <defaults>
</compile_context>

<pallas_src>
import functools

import jax
import jax.numpy as jnp
from jax import lax
from jax.experimental import pallas as pl
from jax.experimental.pallas import tpu as pltpu


# --------------------------------------------------------------------------- #
# Small helpers                                                               #
# --------------------------------------------------------------------------- #
def _round_up(v, m):
    return ((v + m - 1) // m) * m


def _largest_divisor_leq(n, cap):
    cap = max(1, min(n, cap))
    for d in range(cap, 0, -1):
        if n % d == 0:
            return d
    return 1


def _vmem_capacity_bytes():
    """Per-core VMEM capacity (v5e/v6e: 128 MiB, v7x: 64 MiB) with fallback."""
    try:
        info = pltpu.get_tpu_info()
        for name in ("vmem_capacity_bytes", "vmem_bytes", "vmem_size_bytes"):
            cap = getattr(info, name, None)
            if cap:
                return int(cap)
    except Exception:
        pass
    return 64 << 20  # conservative (v7x-sized) fallback


# --------------------------------------------------------------------------- #
# Single-kernel path: whole (Nb, C, HW) block resident in VMEM                #
# --------------------------------------------------------------------------- #
def _channel_attention_kernel(x_ref, w1_ref, w2_ref, o_ref, stats_ref, attn_ref,
                              *, c_chunk, n_chunks, hw_valid, mask_pad, unroll):
    """Fused pool -> MLP -> scale for Nb batch items resident in VMEM.

    x_ref/o_ref : VMEM (Nb, C, HWp) -- HW on lanes (lane-dense), C on sublanes
    w1_ref      : VMEM (CH, C) f32   (fc1 weight, 1x1 conv == matvec)
    w2_ref      : VMEM (C, CH) f32   (fc2 weight)
    stats_ref   : VMEM (C, 2) f32 scratch: col0 = spatial mean, col1 = spatial max
    attn_ref    : VMEM (C, 1) f32 scratch: per-channel gate
    """
    nb = x_ref.shape[0]
    hw_pad = x_ref.shape[2]
    inv_hw = jnp.float32(1.0 / hw_valid)
    if mask_pad:
        valid = lax.broadcasted_iota(jnp.int32, (c_chunk, hw_pad), 1) < hw_valid

    def item_body(b, carry):
        # ---- Pass 1: chunked channel pooling (native dtype, f32 accumulate). --
        def pool_body(i, c):
            c0 = pl.multiple_of(i * c_chunk, c_chunk)
            xc = x_ref[b, pl.ds(c0, c_chunk), :]                       # (cc, HWp)
            s = jnp.sum(xc, axis=1, keepdims=True, dtype=jnp.float32) * inv_hw
            xm = jnp.where(valid, xc, jnp.full_like(xc, -jnp.inf)) if mask_pad else xc
            m = jnp.max(xm, axis=1, keepdims=True).astype(jnp.float32)
            stats_ref[pl.ds(c0, c_chunk), :] = jnp.concatenate([s, m], axis=1)
            return c

        lax.fori_loop(0, n_chunks, pool_body, 0, unroll=unroll)

        # ---- Shared MLP on the two pooled vectors (tiny MXU dots). -----------
        p = stats_ref[...]                                             # (C, 2)
        h = jnp.maximum(
            jnp.dot(w1_ref[...], p, preferred_element_type=jnp.float32), 0.0)
        y = jnp.dot(w2_ref[...], h, preferred_element_type=jnp.float32)
        attn_ref[...] = jax.nn.sigmoid(y[:, 0:1] + y[:, 1:2])          # (C, 1)

        # ---- Pass 2: chunked broadcast-multiply writeback in native dtype. ---
        def scale_body(i, c):
            c0 = pl.multiple_of(i * c_chunk, c_chunk)
            a = attn_ref[pl.ds(c0, c_chunk), :]                        # (cc, 1)
            xc = x_ref[b, pl.ds(c0, c_chunk), :]                       # (cc, HWp)
            o_ref[b, pl.ds(c0, c_chunk), :] = (
                a.astype(xc.dtype) * xc).astype(o_ref.dtype)
            return c

        lax.fori_loop(0, n_chunks, scale_body, 0, unroll=unroll)
        return carry

    lax.fori_loop(0, nb, item_body, 0)


def _single_kernel_path(x2, w1, w2, *, N, C, CH, HW, hw_pad, item_bytes, nb_fit,
                        c_chunk, n_chunks, unroll, vmem_budget):
    mask_pad = hw_pad != HW
    if mask_pad:
        x2 = jnp.pad(x2, ((0, 0), (0, 0), (0, hw_pad - HW)))

    nb_target = max(1, (8 << 20) // item_bytes)          # aim for ~8 MiB DMA tiles
    nb = _largest_divisor_leq(N, min(nb_fit, nb_target))

    kernel = functools.partial(
        _channel_attention_kernel, c_chunk=c_chunk, n_chunks=n_chunks,
        hw_valid=HW, mask_pad=mask_pad, unroll=unroll)

    out = pl.pallas_call(
        kernel,
        out_shape=jax.ShapeDtypeStruct((N, C, hw_pad), x2.dtype),
        grid_spec=pltpu.PrefetchScalarGridSpec(
            num_scalar_prefetch=0,
            grid=(N // nb,),
            in_specs=[
                pl.BlockSpec((nb, C, hw_pad), lambda n: (n, 0, 0)),   # x (lane-dense)
                pl.BlockSpec((CH, C), lambda n: (0, 0)),              # fc1 weight
                pl.BlockSpec((C, CH), lambda n: (0, 0)),              # fc2 weight
            ],
            out_specs=pl.BlockSpec((nb, C, hw_pad), lambda n: (n, 0, 0)),
            scratch_shapes=[
                pltpu.VMEM((C, 2), jnp.float32),   # fused (mean, max) stats
                pltpu.VMEM((C, 1), jnp.float32),   # per-channel gate
            ],
        ),
        compiler_params=pltpu.CompilerParams(
            dimension_semantics=("parallel",),
            vmem_limit_bytes=vmem_budget,
        ),
    )(x2, w1, w2)

    if mask_pad:
        out = out[:, :, :HW]
    return out


# --------------------------------------------------------------------------- #
# Two-pass fallback: per-item block too large to double-buffer in VMEM        #
# --------------------------------------------------------------------------- #
def _pool_mlp_kernel(x_ref, w1_ref, w2_ref, gate_ref, stats_ref,
                     *, c_chunk, n_chunks, hw_valid, hw_tile, mask_pad, unroll):
    """HW-tiled pooling with f32 accumulators; MLP + sigmoid at the last tile.

    x_ref     : VMEM (C, hw_tile) -- one spatial tile of one batch item
    gate_ref  : VMEM (C, 1) f32   -- written only at the last HW tile
    stats_ref : VMEM (C, 2) f32 scratch (col0 = running sum, col1 = running max)
    """
    t = pl.program_id(1)
    cdim = stats_ref.shape[0]

    @pl.when(t == 0)
    def _():
        stats_ref[...] = jnp.concatenate(
            [jnp.zeros((cdim, 1), jnp.float32),
             jnp.full((cdim, 1), -jnp.inf, jnp.float32)], axis=1)

    if mask_pad:
        valid = (lax.broadcasted_iota(jnp.int32, (c_chunk, hw_tile), 1)
                 + t * hw_tile) < hw_valid

    def pool_body(i, c):
        c0 = pl.multiple_of(i * c_chunk, c_chunk)
        xc = x_ref[pl.ds(c0, c_chunk), :]                              # (cc, tile)
        s = jnp.sum(xc, axis=1, keepdims=True, dtype=jnp.float32)
        xm = jnp.where(valid, xc, jnp.full_like(xc, -jnp.inf)) if mask_pad else xc
        m = jnp.max(xm, axis=1, keepdims=True).astype(jnp.float32)
        prev = stats_ref[pl.ds(c0, c_chunk), :]
        stats_ref[pl.ds(c0, c_chunk), :] = jnp.concatenate(
            [prev[:, 0:1] + s, jnp.maximum(prev[:, 1:2], m)], axis=1)
        return c

    lax.fori_loop(0, n_chunks, pool_body, 0, unroll=unroll)

    @pl.when(t == pl.num_programs(1) - 1)
    def _():
        p = stats_ref[...]
        pm = jnp.concatenate(
            [p[:, 0:1] * jnp.float32(1.0 / hw_valid), p[:, 1:2]], axis=1)
        h = jnp.maximum(
            jnp.dot(w1_ref[...], pm, preferred_element_type=jnp.float32), 0.0)
        y = jnp.dot(w2_ref[...], h, preferred_element_type=jnp.float32)
        gate_ref[...] = jax.nn.sigmoid(y[:, 0:1] + y[:, 1:2])


def _scale_kernel(x_ref, gate_ref, o_ref):
    o_ref[...] = (gate_ref[...].astype(x_ref.dtype) * x_ref[...]).astype(o_ref.dtype)


def _two_pass_path(x2, w1, w2, *, N, C, CH, HW, itemsize,
                   c_chunk, n_chunks, unroll, vmem_budget):
    hw128 = _round_up(HW, 128)
    # Target ~4 MiB per (C, hw_tile) tile, capped by the VMEM budget.
    tgt_lanes = max(128, (((4 << 20) // max(1, C * itemsize)) // 128) * 128)
    budget_lanes = max(128, (((vmem_budget // 6) // max(1, C * itemsize)) // 128) * 128)
    hw_tile = min(hw128, tgt_lanes, budget_lanes)
    hw_pad = _round_up(HW, hw_tile)
    n_hw = hw_pad // hw_tile
    mask_pad = hw_pad != HW
    if mask_pad:
        x2 = jnp.pad(x2, ((0, 0), (0, 0), (0, hw_pad - HW)))

    pool_kernel = functools.partial(
        _pool_mlp_kernel, c_chunk=c_chunk, n_chunks=n_chunks, hw_valid=HW,
        hw_tile=hw_tile, mask_pad=mask_pad, unroll=unroll)

    gate = pl.pallas_call(
        pool_kernel,
        out_shape=jax.ShapeDtypeStruct((N, C, 1), jnp.float32),
        grid_spec=pltpu.PrefetchScalarGridSpec(
            num_scalar_prefetch=0,
            grid=(N, n_hw),
            in_specs=[
                pl.BlockSpec((None, C, hw_tile), lambda n, t: (n, 0, t)),
                pl.BlockSpec((CH, C), lambda n, t: (0, 0)),
                pl.BlockSpec((C, CH), lambda n, t: (0, 0)),
            ],
            out_specs=pl.BlockSpec((None, C, 1), lambda n, t: (n, 0, 0)),
            scratch_shapes=[pltpu.VMEM((C, 2), jnp.float32)],
        ),
        compiler_params=pltpu.CompilerParams(
            dimension_semantics=("parallel", "arbitrary"),
            vmem_limit_bytes=vmem_budget,
        ),
    )(x2, w1, w2)

    out = pl.pallas_call(
        _scale_kernel,
        out_shape=jax.ShapeDtypeStruct((N, C, hw_pad), x2.dtype),
        grid_spec=pltpu.PrefetchScalarGridSpec(
            num_scalar_prefetch=0,
            grid=(N, n_hw),
            in_specs=[
                pl.BlockSpec((None, C, hw_tile), lambda n, t: (n, 0, t)),
                pl.BlockSpec((None, C, 1), lambda n, t: (n, 0, 0)),
            ],
            out_specs=pl.BlockSpec((None, C, hw_tile), lambda n, t: (n, 0, t)),
        ),
        compiler_params=pltpu.CompilerParams(
            dimension_semantics=("parallel", "parallel"),
            vmem_limit_bytes=vmem_budget,
        ),
    )(x2, gate)

    if mask_pad:
        out = out[:, :, :HW]
    return out


# --------------------------------------------------------------------------- #
# Public wrapper                                                              #
# --------------------------------------------------------------------------- #
def channel_attention(x, fc1_weight, fc2_weight, *, force_two_pass=False):
    """CBAM ChannelAttention forward.

    x          : (N, C, H, W)
    fc1_weight : (C // r, C, 1, 1)   (nn.Conv2d(C, C//r, 1, bias=False).weight)
    fc2_weight : (C, C // r, 1, 1)   (nn.Conv2d(C//r, C, 1, bias=False).weight)
    returns    : sigmoid(MLP(avgpool(x)) + MLP(maxpool(x))) * x, shape (N, C, H, W)
    """
    N, C, H, W = x.shape
    HW = H * W
    CH = fc1_weight.shape[0]
    itemsize = jnp.dtype(x.dtype).itemsize

    # Lane-dense view: spatial axis (H*W) on lanes, channels on sublanes.
    x2 = x.reshape(N, C, HW)
    w1 = fc1_weight.reshape(CH, C).astype(jnp.float32)
    w2 = fc2_weight.reshape(C, CH).astype(jnp.float32)

    # Per-generation VMEM budget (v5e/v6e ~100 MiB, v7x ~51 MiB) with headroom.
    vmem_budget = int(_vmem_capacity_bytes() * 0.8)

    # Channel chunking: up to 32 sublanes per streamed chunk, bounded unroll.
    # TODO(synk): if C % 8 != 0 with a large C*HW, pad C (and the fc weights) to
    # a multiple of 8 instead of the single-chunk fallback, which can spill.
    c_chunk = C
    for cand in (32, 16, 8):
        if C % cand == 0:
            c_chunk = cand
            break
    n_chunks = C // c_chunk
    unroll = max(1, min(n_chunks, 8))

    # Decide single-kernel vs two-pass: does a double-buffered (1, C, HWp)
    # in+out block pair fit in the budget?
    hw_pad = HW if HW % 128 == 0 else _round_up(HW, 128)
    item_bytes = C * hw_pad * itemsize
    fixed_bytes = 2 * int(w1.size + w2.size) * 4 + 3 * C * 4 + (1 << 20)
    nb_fit = (vmem_budget - fixed_bytes) // (4 * item_bytes)

    if force_two_pass or nb_fit < 1:
        out = _two_pass_path(x2, w1, w2, N=N, C=C, CH=CH, HW=HW, itemsize=itemsize,
                             c_chunk=c_chunk, n_chunks=n_chunks, unroll=unroll,
                             vmem_budget=vmem_budget)
    else:
        out = _single_kernel_path(x2, w1, w2, N=N, C=C, CH=CH, HW=HW,
                                  hw_pad=hw_pad, item_bytes=item_bytes,
                                  nb_fit=int(nb_fit), c_chunk=c_chunk,
                                  n_chunks=n_chunks, unroll=unroll,
                                  vmem_budget=vmem_budget)
    return out.reshape(N, C, H, W)


# --------------------------------------------------------------------------- #
# Pure-JAX reference of the PyTorch ChannelAttention forward                  #
# --------------------------------------------------------------------------- #
def reference(x, fc1_weight, fc2_weight):
    w1 = fc1_weight.reshape(fc1_weight.shape[0], fc1_weight.shape[1])  # (CH, C)
    w2 = fc2_weight.reshape(fc2_weight.shape[0], fc2_weight.shape[1])  # (C, CH)
    avg = jnp.mean(x, axis=(2, 3))                                     # (N, C)
    mx = jnp.max(x, axis=(2, 3))                                       # (N, C)

    def mlp(p):
        h = jax.nn.relu(jnp.einsum("nc,oc->no", p, w1,
                                   precision=lax.Precision.HIGHEST))
        return jnp.einsum("nh,oh->no", h, w2,
                          precision=lax.Precision.HIGHEST)

    a = jax.nn.sigmoid(mlp(avg) + mlp(mx))                             # (N, C)
    return a[:, :, None, None] * x


if __name__ == "__main__":
    key = jax.random.PRNGKey(0)
    kx, k1, k2 = jax.random.split(key, 3)

    # reduction=16 requires in_planes >= 16, so use C=32 -> hidden=2.
    N, C, H, W = 2, 32, 16, 16
    reduction = 16
    CH = C // reduction

    x = jax.random.normal(kx, (N, C, H, W), dtype=jnp.float32)
    fc1_w = jax.random.normal(k1, (CH, C, 1, 1), dtype=jnp.float32) * (C ** -0.5)
    fc2_w = jax.random.normal(k2, (C, CH, 1, 1), dtype=jnp.float32) * (CH ** -0.5)

    ref = reference(x, fc1_w, fc2_w)

    # 1) Default single-kernel path (batch-folded block).
    out = jax.block_until_ready(channel_attention(x, fc1_w, fc2_w))
    assert out.shape == (N, C, H, W)
    err = float(jnp.max(jnp.abs(out - ref)))
    assert jnp.allclose(out, ref, atol=1e-3, rtol=1e-3), err

    # 2) Two-pass fallback path (HW-tiled pool+MLP kernel, then scale kernel).
    out2 = jax.block_until_ready(
        channel_attention(x, fc1_w, fc2_w, force_two_pass=True))
    err2 = float(jnp.max(jnp.abs(out2 - ref)))
    assert jnp.allclose(out2, ref, atol=1e-3, rtol=1e-3), err2

    # 3) Lane-padding / masking path (HW = 49, not a multiple of 128).
    x_odd = jax.random.normal(kx, (N, C, 7, 7), dtype=jnp.float32)
    ref_odd = reference(x_odd, fc1_w, fc2_w)
    out3 = jax.block_until_ready(channel_attention(x_odd, fc1_w, fc2_w))
    err3 = float(jnp.max(jnp.abs(out3 - ref_odd)))
    assert jnp.allclose(out3, ref_odd, atol=1e-3, rtol=1e-3), err3

    print("KERNEL_OK")
</pallas_src>

<mosaic_0001>
module attributes {stable_mosaic.version = 11 : i64} {
  func.func @_channel_attention_kernel(%arg0: i32, %arg1: memref<2x32x256xf32, #tpu.memory_space<vmem>>, %arg2: memref<2x32xf32, #tpu.memory_space<vmem>>, %arg3: memref<32x2xf32, #tpu.memory_space<vmem>>, %arg4: memref<2x32x256xf32, #tpu.memory_space<vmem>>, %arg5: memref<32x2xf32, #tpu.memory_space<vmem>>, %arg6: memref<32x1xf32, #tpu.memory_space<vmem>>) attributes {dimension_semantics = [#tpu.dimension_semantics<parallel>], iteration_bounds = array<i64: 1>, scalar_prefetch = 0 : i64, scratch_operands = 2 : i64, tpu.core_type = #tpu.core_type<tc>, window_params = [{transform_indices = @transform_0, window_bounds = array<i64: 2, 32, 256>}, {pipeline_mode = #tpu.pipeline_mode<synchronous>, transform_indices = @transform_1, window_bounds = array<i64: 2, 32>}, {pipeline_mode = #tpu.pipeline_mode<synchronous>, transform_indices = @transform_2, window_bounds = array<i64: 32, 2>}, {transform_indices = @transform_3, window_bounds = array<i64: 2, 32, 256>}]} {
    %cst = arith.constant 3.906250e-03 : f32
    %c0_i32 = arith.constant 0 : i32
    %c2_i32 = arith.constant 2 : i32
    %0 = arith.addi %c0_i32, %c2_i32 : i32
    %c1_i32 = arith.constant 1 : i32
    scf.for %arg7 = %c0_i32 to %0 step %c1_i32  : i32 {
      %c0_i32_1 = arith.constant 0 : i32
      %c32_i32 = arith.constant 32 : i32
      %1 = arith.muli %c0_i32_1, %c32_i32 : i32
      %2 = tpu.assume_multiple %1, 32 : i32
      %3 = arith.index_cast %arg7 : i32 to index
      %4 = arith.index_cast %2 : i32 to index
      %c0 = arith.constant 0 : index
      %5 = vector.load %arg1[%3, %4, %c0] : memref<2x32x256xf32, #tpu.memory_space<vmem>>, vector<1x32x256xf32>
      %6 = vector.shape_cast %5 : vector<1x32x256xf32> to vector<32x256xf32>
      %cst_2 = arith.constant dense<0.000000e+00> : vector<32xf32>
      %7 = vector.multi_reduction <add>, %6, %cst_2 [1] : vector<32x256xf32> to vector<32xf32>
      %8 = vector.shape_cast %7 : vector<32xf32> to vector<32x1xf32>
      %9 = vector.broadcast %cst : f32 to vector<32x1xf32>
      %10 = arith.mulf %8, %9 : vector<32x1xf32>
      %cst_3 = arith.constant dense<0xFF800000> : vector<32xf32>
      %11 = vector.multi_reduction <maximumf>, %6, %cst_3 [1] : vector<32x256xf32> to vector<32xf32>
      %12 = vector.shape_cast %11 : vector<32xf32> to vector<32x1xf32>
      %13 = tpu.concatenate %10, %12 in 1 : vector<32x1xf32>, vector<32x1xf32> -> vector<32x2xf32>
      %14 = arith.index_cast %2 : i32 to index
      %c0_4 = arith.constant 0 : index
      %15 = vector.load %arg5[%14, %c0_4] : memref<32x2xf32, #tpu.memory_space<vmem>>, vector<32x2xf32>
      tpu.vector_store %arg5[%14, %c0_4], %13 {strides = array<i32>} : memref<32x2xf32, #tpu.memory_space<vmem>>, vector<32x2xf32>,
      %c1_i32_5 = arith.constant 1 : i32
      %c0_6 = arith.constant 0 : index
      %c0_7 = arith.constant 0 : index
      %16 = vector.load %arg5[%c0_6, %c0_7] : memref<32x2xf32, #tpu.memory_space<vmem>>, vector<32x2xf32>
      %c0_8 = arith.constant 0 : index
      %c0_9 = arith.constant 0 : index
      %17 = vector.load %arg2[%c0_8, %c0_9] : memref<2x32xf32, #tpu.memory_space<vmem>>, vector<2x32xf32>
      %cst_10 = arith.constant dense<0.000000e+00> : vector<2x2xf32>
      %18 = tpu.matmul %17, %16, %cst_10 {dimension_numbers = #tpu.dot_dimension_numbers<[1], [0], [0], [1], [0, 0, 1, 1], [], []>} : vector<2x32xf32>, vector<32x2xf32>, vector<2x2xf32> -> vector<2x2xf32>
      %cst_11 = arith.constant 0.000000e+00 : f32
      %19 = vector.broadcast %cst_11 : f32 to vector<2x2xf32>
      %20 = arith.maximumf %18, %19 : vector<2x2xf32>
      %c0_12 = arith.constant 0 : index
      %c0_13 = arith.constant 0 : index
      %21 = vector.load %arg3[%c0_12, %c0_13] : memref<32x2xf32, #tpu.memory_space<vmem>>, vector<32x2xf32>
      %cst_14 = arith.constant dense<0.000000e+00> : vector<32x2xf32>
      %22 = tpu.matmul %21, %20, %cst_14 {dimension_numbers = #tpu.dot_dimension_numbers<[1], [0], [0], [1], [0, 0, 1, 1], [], []>} : vector<32x2xf32>, vector<2x2xf32>, vector<32x2xf32> -> vector<32x2xf32>
      %23 = vector.extract_strided_slice %22 {offsets = [0, 0], sizes = [32, 1], strides = [1, 1]} : vector<32x2xf32> to vector<32x1xf32>
      %24 = vector.extract_strided_slice %22 {offsets = [0, 1], sizes = [32, 1], strides = [1, 1]} : vector<32x2xf32> to vector<32x1xf32>
      %25 = arith.addf %23, %24 : vector<32x1xf32>
      %26 = arith.negf %25 : vector<32x1xf32>
      %27 = math.exp %26 : vector<32x1xf32>
      %cst_15 = arith.constant 1.000000e+00 : f32
      %28 = vector.broadcast %cst_15 : f32 to vector<32x1xf32>
      %29 = arith.addf %28, %27 : vector<32x1xf32>
      %30 = arith.divf %28, %29 : vector<32x1xf32>
      %c0_16 = arith.constant 0 : index
      %c0_17 = arith.constant 0 : index
      %31 = vector.load %arg6[%c0_16, %c0_17] : memref<32x1xf32, #tpu.memory_space<vmem>>, vector<32x1xf32>
      tpu.vector_store %arg6[%c0_16, %c0_17], %30 {strides = array<i32>} : memref<32x1xf32, #tpu.memory_space<vmem>>, vector<32x1xf32>,
      %c0_i32_18 = arith.constant 0 : i32
      %c32_i32_19 = arith.constant 32 : i32
      %32 = arith.muli %c0_i32_18, %c32_i32_19 : i32
      %33 = tpu.assume_multiple %32, 32 : i32
      %34 = arith.index_cast %33 : i32 to index
      %c0_20 = arith.constant 0 : index
      %35 = vector.load %arg6[%34, %c0_20] : memref<32x1xf32, #tpu.memory_space<vmem>>, vector<32x1xf32>
      %36 = arith.index_cast %arg7 : i32 to index
      %37 = arith.index_cast %33 : i32 to index
      %c0_21 = arith.constant 0 : index
      %38 = vector.load %arg1[%36, %37, %c0_21] : memref<2x32x256xf32, #tpu.memory_space<vmem>>, vector<1x32x256xf32>
      %39 = vector.shape_cast %38 : vector<1x32x256xf32> to vector<32x256xf32>
      %40 = vector.broadcast %35 : vector<32x1xf32> to vector<32x256xf32>
      %41 = arith.mulf %40, %39 : vector<32x256xf32>
      %42 = arith.index_cast %arg7 : i32 to index
      %43 = arith.index_cast %33 : i32 to index
      %c0_22 = arith.constant 0 : index
      %44 = vector.load %arg4[%42, %43, %c0_22] : memref<2x32x256xf32, #tpu.memory_space<vmem>>, vector<1x32x256xf32>
      %45 = vector.shape_cast %44 : vector<1x32x256xf32> to vector<32x256xf32>
      %46 = vector.shape_cast %41 : vector<32x256xf32> to vector<1x32x256xf32>
      tpu.vector_store %arg4[%42, %43, %c0_22], %46 {strides = array<i32>} : memref<2x32x256xf32, #tpu.memory_space<vmem>>, vector<1x32x256xf32>,
      %c1_i32_23 = arith.constant 1 : i32
    }
    %c2_i32_0 = arith.constant 2 : i32
    return
  }
  func.func @transform_0(%arg0: i32) -> (i32, i32, i32) {
    %c0_i32 = arith.constant 0 : i32
    %c0_i32_0 = arith.constant 0 : i32
    %c0_i32_1 = arith.constant 0 : i32
    return %arg0, %c0_i32, %c0_i32_0 : i32, i32, i32
  }
  func.func @transform_1(%arg0: i32) -> (i32, i32) {
    %c0_i32 = arith.constant 0 : i32
    %c0_i32_0 = arith.constant 0 : i32
    %c0_i32_1 = arith.constant 0 : i32
    return %c0_i32, %c0_i32_0 : i32, i32
  }
  func.func @transform_2(%arg0: i32) -> (i32, i32) {
    %c0_i32 = arith.constant 0 : i32
    %c0_i32_0 = arith.constant 0 : i32
    %c0_i32_1 = arith.constant 0 : i32
    return %c0_i32, %c0_i32_0 : i32, i32
  }
  func.func @transform_3(%arg0: i32) -> (i32, i32, i32) {
    %c0_i32 = arith.constant 0 : i32
    %c0_i32_0 = arith.constant 0 : i32
    %c0_i32_1 = arith.constant 0 : i32
    return %arg0, %c0_i32, %c0_i32_0 : i32, i32, i32
  }
}

</mosaic_0001>

<bundles_post_ra>
// kernel: tpu_custom_call.1
= control target key start
LH: loop header
LB: loop body
LE: loop exit
PB: predicated region body
PF: predicated region fallthrough
CT: control target
= control target key end

     0   :  { %8 = vsyncpa [#allocation5], 0  ;;  %s681_s0 = inlined_call_operand.hbm [shape: f32[2,32,256], index: 0, kind: input, shape index: {}]   ;;  %s682_s1 = inlined_call_operand.vmem [shape: f32[2,32], index: 1, kind: input, shape index: {}]   ;;  %s683_s2 = inlined_call_operand.vmem [shape: f32[32,2], index: 2, kind: input, shape index: {}]   ;;  %s684_s3 = inlined_call_operand.hbm [shape: f32[2,32,256], index: 3, kind: output, shape index: {}]  }
   0x1   :  { %9 = vsyncpa [#allocation6], 0  ;;  %s538_s12 = smov [#allocation4]   ;;  %s482_s16 = scalar_lea.hbm %s681_s0, 2048 }
   0x2   :  { %s15_s13 = sshll.u32 %s538_s12, 4  ;;  %p483_p0 = scmp.ne.s32.totalorder %s681_s0, %s482_s16  ;;  %s16_s13 = int_to_ptr.vmem [resolvable:$true] %s15_s13 }
   0x3   :  { %p486_p1 = scmp.lt.u32.totalorder %s482_s16, %s681_s0 }
   0x5   :  { %p488_p2 = pnand %p486_p1, %p483_p0 }
   0x7   :  { %491 = shalt.err (!%p488_p2)
}
   0x8   :  { %s492_s21 = scalar_lea.vmem %s16_s13, 2048  ;;  %p497_p4 = scmp.lt.s32.totalorder %s16_s13, %s16_s13 }
   0x9   :  { %p493_p3 = scmp.ne.s32.totalorder %s16_s13, %s492_s21  ;;  %p498_p5 = scmp.lt.s32.totalorder %s492_s21, %s492_s21 }
   0xb   :  { %p499_p6 = por %p498_p5, %p497_p4 }
   0xd   :  { %p500_p7 = pnand %p499_p6, %p493_p3 }
   0xf   :  { %503 = shalt.err (!%p500_p7)
}
  0x10   :  { %s539_s22 = smov 256   ;;  %s540_s23 = smov 16  }
  0x11   :  { %21 = dma.hbm_to_vmem [thread:$0]  %s681_s0, 2048, %s16_s13, [#allocation5], %s539_s22, %s539_s22, %s540_s23  }
  0x12   :  { %530 = dma.done.wait [#allocation5], 2048  }
  0x13   :  { %531 = vsyncadd [#allocation5], 4294965248  ;;  %s582_s26 = smov 0  }
  0x14 LB: > { %s410_s27 = sshll.u32 %s536_s26, 6  ;;  %v541_v16 = vmov 0.0|0.0   ;;  %vm542_vm0 = vmmov 0   ;;  %v543_v17 = vmov 0.0   ;;  %vm76_vm1 = vcmask 7168   ;;  %v166_v41 = vld [vmem:[%s683_s2] sm:$0xff]  ;;  %s536_s26 = sphi %s582_s26, %s34_s26  }
  0x15   : > { %s39_s28 = scalar_lea.vmem [#allocation4], %s410_s27  ;;  %441 = vmatprep.subr.bf16.mxu0 %v541_v16  ;;  %430 = vmatprep.mubr.msk.f32.mxu0 %vm542_vm0, %v543_v17  ;;  %vm81_vm2 = vcmask 15360   ;;  %v90_v40 = vld [vmem:[%s682_s1] sm:$0x3]  ;;  %vm91_vm3 = vcmask 261120   ;;  %vm182_vm4 = vcmask 1041408  }
  0x16   : > { %v590_v0 = vld [vmem:[%s39_s28] sm:$0xff]  ;;  %v592_v1 = vld [vmem:[%s39_s28 + $0x8] sm:$0xff]  ;;  %v594_v2 = vld [vmem:[%s39_s28 + $0x10] sm:$0xff]  ;;  %435 = vmatprep.mubr.msk.f32.mxu1 %vm81_vm2, %v166_v41  ;;  %s544_s11 = smov 127   ;;  %v545_v52 = vmov 0   ;;  %s360_s12 = scalar_lea.vmem [#allocation7], %s410_s27 }
  0x17   : > { %v64_v3 = vmax.f32 %v590_v0, %v592_v1  ;;  %v48_v4 = vadd.f32 %v592_v1, %v590_v0  ;;  %v600_v5 = vld [vmem:[%s39_s28 + $0x18] sm:$0xff]  ;;  %v606_v8 = vld [vmem:[%s39_s28 + $0x30] sm:$0xff]  ;;  %v610_v10 = vld [vmem:[%s39_s28 + $0x20] sm:$0xff]  ;;  %464 = vset.pattern.permute.xlu1 %v545_v52  ;;  %465 = vset.pattern.permute.xlu0 %v545_v52  ;;  %s34_s26 = sadd.s32 1, %s536_s26  }
  0x18   : > { %v67_v6 = vmax.f32 %v594_v2, %v600_v5  ;;  %v51_v7 = vadd.f32 %v600_v5, %v594_v2  ;;  %v608_v9 = vld [vmem:[%s39_s28 + $0x38] sm:$0xff]  ;;  %v612_v11 = vld [vmem:[%s39_s28 + $0x28] sm:$0xff]  ;;  %v168_v46 = vld [vmem:[%s683_s2 + $0x10] sm:$0xff]  ;;  %p31_p8 = scmp.ge.s32.totalorder %s34_s26, 2  }
  0x19   : > { %65 = vmax.xlane.f32.xlu1 %v64_v3  ;;  %49 = vadd.xlane.f32.xlu0 %v48_v4  ;;  %v57_v12 = vadd.f32 %v608_v9, %v606_v8  ;;  %v54_v13 = vadd.f32 %v612_v11, %v610_v10  ;;  %v73_v14 = vmax.f32 %v606_v8, %v608_v9  ;;  %v167_v45 = vld [vmem:[%s683_s2 + $0x8] sm:$0xff]  ;;  %v169_v47 = vld [vmem:[%s683_s2 + $0x18] sm:$0xff]  ;;  %s546_s13 = smov (%p31_p8), [#allocation7]  }
  0x1a   : > { %v70_v15 = vmax.f32 %v610_v10, %v612_v11  ;;  %s374_s14 = sshll.u32 (%p31_p8), %s546_s13, 4  ;;  %s375_s14 = int_to_ptr.vmem [resolvable:$true] %s374_s14 }
  0x1b   :  { %s504_s15 = scalar_lea.vmem (%p31_p8), %s375_s14, 2048  ;;  %p509_p10 = scmp.lt.s32.totalorder (%p31_p8), %s375_s14, %s375_s14 }
  0x1c   :  { %p505_p9 = scmp.ne.s32.totalorder (%p31_p8), %s375_s14, %s504_s15  ;;  %p510_p11 = scmp.lt.s32.totalorder (%p31_p8), %s504_s15, %s504_s15 }
  0x1d   : > { %68 = vmax.xlane.f32.xlu1 %v67_v6  ;;  %52 = vadd.xlane.f32.xlu0 %v51_v7 }
  0x1e   :  { %p511_p12 = por (%p31_p8), %p510_p11, %p509_p10 }
  0x20   :  { %p512_p13 = pnand (%p31_p8), %p511_p12, %p505_p9 }
  0x21   : > { %58 = vadd.xlane.f32.xlu1 %v57_v12  ;;  %55 = vadd.xlane.f32.xlu0 %v54_v13 }
  0x25   : > { %74 = vmax.xlane.f32.xlu1 %v73_v14  ;;  %71 = vmax.xlane.f32.xlu0 %v70_v15 }
  0xa6   : > { %v66_v18 = vpop.xlane.xlu1 %65  ;;  %v50_v19 = vpop.xlane.xlu0 %49 }
  0xa7   : > { %v60_v20 = vmul.f32 0.00390625, %v50_v19 }
  0xa9   : > { %v77_v21 = vsel %vm76_vm1, %v60_v20, %v66_v18 }
  0xaa   : > { %82 = vst.msk [vmem:[#allocation2] sm:$0xff] %vm81_vm2, %v77_v21  ;;  %v69_v22 = vpop.xlane.xlu1 %68  ;;  %v53_v23 = vpop.xlane.xlu0 %52 }
  0xab   : > { %v61_v24 = vmul.f32 0.00390625, %v53_v23 }
  0xad   : > { %v78_v25 = vsel %vm76_vm1, %v61_v24, %v69_v22 }
  0xae   : > { %83 = vst.msk [vmem:[#allocation2 + $0x8] sm:$0xff] %vm81_vm2, %v78_v25  ;;  %v59_v26 = vpop.xlane.xlu1 %58  ;;  %v56_v27 = vpop.xlane.xlu0 %55 }
  0xaf   : > { %v63_v28 = vmul.f32 0.00390625, %v59_v26  ;;  %v62_v29 = vmul.f32 0.00390625, %v56_v27 }
  0xb1   : > { %v86_v34 = vld [vmem:[#allocation2] sm:$0xff] }
  0xb2   : > { %v75_v30 = vpop.xlane.xlu1 %74  ;;  %v72_v31 = vpop.xlane.xlu0 %71 }
  0xb3   : > { %v80_v32 = vsel %vm76_vm1, %v63_v28, %v75_v30  ;;  %v79_v33 = vsel %vm76_vm1, %v62_v29, %v72_v31 }
  0xb4   : > { %85 = vst.msk [vmem:[#allocation2 + $0x18] sm:$0xff] %vm81_vm2, %v80_v32  ;;  %84 = vst.msk [vmem:[#allocation2 + $0x10] sm:$0xff] %vm81_vm2, %v79_v33 }
  0xb5   : > { %v87_v35 = vld [vmem:[#allocation2 + $0x8] sm:$0xff] }
  0xb6   : > { %v442_v36 = vpack.c.bf16 %v87_v35, %v86_v34 }
  0xb8   : > { %443 = vmatpush3.bf16.msra.mxu0 %v442_v36 }
  0xb9   : > { %444 = vmatprep.subr.bf16.mxu0 %v541_v16 }
  0xbb   : > { %v88_v37 = vld [vmem:[#allocation2 + $0x10] sm:$0xff]  ;;  %v89_v38 = vld [vmem:[#allocation2 + $0x18] sm:$0xff] }
  0xbc   : > { %v445_v39 = vpack.c.bf16 %v89_v38, %v88_v37 }
  0xbe   : > { %446 = vmatpush3.bf16.msra.mxu0 %v445_v39 }
  0xc1   : > { %431 = vmatmul.mubr.msk.f32.vlgmr.msra.gmra.mrb[0].mxu0 %vm91_vm3, %v90_v40 }
 0x194   : > { %v161_v42 = vpop.f32.mrb[0].mxu0 }
 0x195   : > { %v165_v43 = vmax.f32 %v161_v42, 0.0  ;;  %v432_v44 = vpop.f32.mrb[1].mxu0 }
 0x197   : > { %433 = vmatprep.subr.msk.mxu1 %vm182_vm4, %v165_v43 }
 0x198   : > { %434 = vmatpush3.msk.msra.mxu1 %vm182_vm4, %v165_v43 }
 0x199   : > { %436 = vmatmul.mubr.msk.f32.vlgmr.msra.gmra.mrb[0].mxu1 %vm81_vm2, %v167_v45 }
 0x19a   : > { %438 = vmatprep.mubr.msk.f32.mxu1 %vm81_vm2, %v168_v46 }
 0x19d   : > { %439 = vmatmul.mubr.msk.f32.gmra.mrb[2].mxu1 %vm81_vm2, %v169_v47 }
 0x26c   : > { %v437_v48 = vpop.f32.mrb[0].mxu1 }
 0x26d   : > { %277 = vrot.lane.b32.xlu1 %v437_v48, %s544_s11  ;;  %v252_v49 = vpop.f32.mrb[1].mxu1 }
 0x26e   : > { %275 = vrot.lane.b32.xlu0 %v252_v49, %s544_s11 }
 0x270   : > { %v440_v50 = vpop.f32.mrb[2].mxu1 }
 0x271   : > { %v262_v51 = vpop.f32.mrb[3].mxu1 }
 0x272   : > { %279 = vrot.lane.b32.xlu1 %v262_v51, %s544_s11 }
 0x276   : > { %281 = vrot.lane.b32.xlu1 %v440_v50, %s544_s11 }
 0x2df   : > { %v278_v53 = vpop.permute.xlu1 %277 }
 0x2e0   : > { %v288_v54 = vadd.f32 %v437_v48, %v278_v53  ;;  %v276_v55 = vpop.permute.xlu0 %275 }
 0x2e1   : > { %v287_v56 = vadd.f32 %v276_v55, %v252_v49 }
 0x2e2   : > { %v406_v57 = vmul.f32 -1.442695, %v288_v54 }
 0x2e3   : > { %v405_v58 = vmul.f32 -1.442695, %v287_v56 }
 0x2e4   : > { %466 = vpow2.f32 %v406_v57  ;;  %v280_v59 = vpop.permute.xlu1 %279 }
 0x2e5   : > { %468 = vpow2.f32 %v405_v58  ;;  %v289_v60 = vadd.f32 %v280_v59, %v262_v51 }
 0x2e7   : > { %v407_v61 = vmul.f32 -1.442695, %v289_v60 }
 0x2e8   : > { %v282_v62 = vpop.permute.xlu1 %281 }
 0x2e9   : > { %470 = vpow2.f32 %v407_v61  ;;  %v290_v63 = vadd.f32 %v440_v50, %v282_v62 }
 0x2eb   : > { %v408_v3 = vmul.f32 -1.442695, %v290_v63 }
 0x2ed   : > { %472 = vpow2.f32 %v408_v3 }
 0x2ee   : > { %v467_v4 = vpop.eup %466 }
 0x2ef   : > { %v469_v6 = vpop.eup %468  ;;  %v304_v7 = vadd.f32 1.0, %v467_v4 }
 0x2f0   : > { %v303_v12 = vadd.f32 1.0, %v469_v6 }
 0x2f1   : > { %474 = vrcp.f32 %v304_v7 }
 0x2f2   : > { %476 = vrcp.f32 %v303_v12 }
 0x2f3   : > { %v471_v13 = vpop.eup %470 }
 0x2f4   : > { %v305_v14 = vadd.f32 1.0, %v471_v13 }
 0x2f6   : > { %478 = vrcp.f32 %v305_v14 }
 0x2f7   : > { %v473_v15 = vpop.eup %472 }
 0x2f8   : > { %v306_v16 = vadd.f32 1.0, %v473_v15 }
 0x2fa   : > { %480 = vrcp.f32 %v306_v16 }
 0x2fb   : > { %v475_v17 = vpop.eup %474 }
 0x2fc   : > { %v477_v18 = vpop.eup %476  ;;  %316 = vst.msk [vmem:[#allocation3 + $0x8] sm:$0xff] %vm76_vm1, %v475_v17 }
 0x2fd   : > { %315 = vst.msk [vmem:[#allocation3] sm:$0xff] %vm76_vm1, %v477_v18 }
 0x300   : > { %v479_v19 = vpop.eup %478 }
 0x301   : > { %317 = vst.msk [vmem:[#allocation3 + $0x10] sm:$0xff] %vm76_vm1, %v479_v19 }
 0x303   : > { %v320_v20 = vld [vmem:[#allocation3 + $0x8] sm:$0xff] }
 0x304   : > { %v481_v21 = vpop.eup %480  ;;  %338 = vperm.xlu1 %464, %v320_v20   ;;  %v319_v22 = vld [vmem:[#allocation3] sm:$0xff] }
 0x305   : > { %318 = vst.msk [vmem:[#allocation3 + $0x18] sm:$0xff] %vm76_vm1, %v481_v21  ;;  %333 = vperm.xlu0 %465, %v319_v22  }
 0x308   : > { %v321_v23 = vld [vmem:[#allocation3 + $0x10] sm:$0xff] }
 0x309   : > { %343 = vperm.xlu1 %464, %v321_v23  }
 0x30c   : > { %v322_v24 = vld [vmem:[#allocation3 + $0x18] sm:$0xff] }
 0x30d   : > { %348 = vperm.xlu0 %465, %v322_v24  }
 0x383   : > { %v339_v25 = vpop.permute.xlu1 %338 }
 0x384   : > { %v353_v26 = vmul.f32 %v339_v25, %v594_v2  ;;  %v354_v27 = vmul.f32 %v339_v25, %v600_v5  ;;  %v334_v28 = vpop.permute.xlu0 %333 }
 0x385   : > { %v351_v29 = vmul.f32 %v334_v28, %v590_v0  ;;  %v352_v30 = vmul.f32 %v334_v28, %v592_v1 }
 0x386   : > { %363 = vst [vmem:[%s360_s12 + $0x10] sm:$0xff] %v353_v26  ;;  %364 = vst [vmem:[%s360_s12 + $0x18] sm:$0xff] %v354_v27 }
 0x387   : > { %361 = vst [vmem:[%s360_s12] sm:$0xff] %v351_v29  ;;  %362 = vst [vmem:[%s360_s12 + $0x8] sm:$0xff] %v352_v30 }
 0x388   : > { %v344_v31 = vpop.permute.xlu1 %343 }
 0x389   : > { %v355_v32 = vmul.f32 %v344_v31, %v610_v10  ;;  %v356_v33 = vmul.f32 %v344_v31, %v612_v11  ;;  %33 = sbr.rel (!%p31_p8) target bundleno = 20 (0x14), region = 45 }
 0x38b   : > { %365 = vst [vmem:[%s360_s12 + $0x20] sm:$0xff] %v355_v32  ;;  %366 = vst [vmem:[%s360_s12 + $0x28] sm:$0xff] %v356_v33 }
 0x38c   : > { %v349_v2 = vpop.permute.xlu0 %348 }
 0x38d   : > { %v357_v5 = vmul.f32 %v349_v2, %v606_v8  ;;  %v358_v0 = vmul.f32 %v349_v2, %v608_v9 }
 0x38f   : > { %367 = vst [vmem:[%s360_s12 + $0x30] sm:$0xff] %v357_v5  ;;  %368 = vst [vmem:[%s360_s12 + $0x38] sm:$0xff] %v358_v0 }
 0x390   :  { %515 = shalt.err (!%p512_p13)
}
 0x391   :  { %s516_s18 = scalar_lea.hbm %s684_s3, 2048 }
 0x392   :  { %p517_p0 = scmp.ne.s32.totalorder %s684_s3, %s516_s18  ;;  %p520_p1 = scmp.lt.u32.totalorder %s516_s18, %s684_s3 }
 0x394   :  { %p522_p2 = pnand %p520_p1, %p517_p0 }
 0x396   :  { %525 = shalt.err (!%p522_p2)
}
 0x397   :  { %380 = dma.vmem_to_hbm [thread:$0]  %s375_s14, 2048, %s684_s3, [#allocation6], %s539_s22, %s539_s22, %s540_s23  }
 0x398   :  { %532 = dma.done.wait [#allocation6], 2048  }
 0x399   :  { %533 = vsyncadd [#allocation6], 4294965248 }
 0x39a   :  { %384 = vsyncpa [#allocation5], 1 }
 0x39b   :  { %385 = vsyncpa [#allocation6], 1 }

</bundles_post_ra>
